<compile_context>
chip_gen: v6e
topology: v6e:2x2x1
jax: 0.10.0
libtpu: 0.0.40
codegen_flags: <defaults>
</compile_context>

<pallas_src>
import functools

import jax
import jax.numpy as jnp
from jax.experimental import pallas as pl
from jax.experimental.pallas import tpu as pltpu


def lstm_kernel(x_ref, w_ih_ref, w_hh_ref, b_ref, fc_w_ref, fc_b_ref, out_ref,
                *, hidden_dim, seq_len, batch, input_dim):
    H = hidden_dim
    T = seq_len
    B = batch
    D = input_dim
    H4 = 4 * H

    b = b_ref[...]                                   # (1, 4H)  == b_ih + b_hh

    # ---- Pre-pass (off the serial chain): input projection for all timesteps.
    # Held as a kernel-local value (vregs), not a VMEM scratch.
    x = x_ref[...]                                   # (B, T, D)
    if D == 1:
        # Contraction dim of 1: one VPU lane-broadcast multiply, no MXU push.
        gx = x * w_ih_ref[...].reshape(1, 1, H4) + b.reshape(1, 1, H4)   # (B, T, 4H)
    else:
        gx = (jnp.dot(x.reshape(B * T, D), w_ih_ref[...],
                      preferred_element_type=jnp.float32).reshape(B, T, H4)
              + b.reshape(1, 1, H4))

    # Hoisted out of the recurrence: W_hh resident in vregs, zero-init state
    # (matches the PyTorch forward's h0 = c0 = 0).
    w_hh = w_hh_ref[...]                             # (H, 4H)
    h = jnp.zeros((B, H), jnp.float32)
    c = jnp.zeros((B, H), jnp.float32)

    # ---- Serial recurrence: static Python unroll (T is small and static), so
    # every slice below is a static slice.  Only h @ W_hh + gate math per step.
    for t in range(T):
        gates = gx[:, t, :] + jnp.dot(h, w_hh,
                                      preferred_element_type=jnp.float32)  # (B, 4H)

        # Hand-rolled sigmoid: exp (EUP) + approximate reciprocal (EUP),
        # avoiding an exact divide on the critical path.
        sig = pl.reciprocal(1.0 + jnp.exp(-gates), approx=True)
        tnh = jnp.tanh(gates)

        # PyTorch gate order: i, f, g, o.
        i_g = sig[:, 0:H]
        f_g = sig[:, H:2 * H]
        g_g = tnh[:, 2 * H:3 * H]
        o_g = sig[:, 3 * H:4 * H]

        c = f_g * c + i_g * g_g
        h = o_g * jnp.tanh(c)

    # Fused fc(out[:, -1, :]); out_ref written exactly once.
    out_ref[...] = (jnp.dot(h, fc_w_ref[...], preferred_element_type=jnp.float32)
                    + fc_b_ref[...])


def traffic_lstm_forward(x, w_ih, w_hh, b, fc_w, fc_b):
    B, T, D = x.shape
    H4 = w_ih.shape[1]
    H = H4 // 4
    output_dim = fc_w.shape[1]

    kernel = functools.partial(lstm_kernel, hidden_dim=H, seq_len=T,
                               batch=B, input_dim=D)

    vmem = pl.BlockSpec(memory_space=pltpu.MemorySpace.VMEM)
    return pl.pallas_call(
        kernel,
        out_shape=jax.ShapeDtypeStruct((B, output_dim), jnp.float32),
        in_specs=[vmem, vmem, vmem, vmem, vmem, vmem],
        out_specs=vmem,
    )(x, w_ih, w_hh, b, fc_w, fc_b)


def traffic_lstm_reference(x, w_ih, w_hh, b, fc_w, fc_b):
    """Pure-JAX reference (PyTorch nn.LSTM semantics, gate order i,f,g,o)."""
    B, T, _ = x.shape
    H = w_hh.shape[0]

    def step(carry, x_t):
        h, c = carry
        gates = x_t @ w_ih + h @ w_hh + b[0]
        i_g = jax.nn.sigmoid(gates[:, 0:H])
        f_g = jax.nn.sigmoid(gates[:, H:2 * H])
        g_g = jnp.tanh(gates[:, 2 * H:3 * H])
        o_g = jax.nn.sigmoid(gates[:, 3 * H:4 * H])
        c_new = f_g * c + i_g * g_g
        h_new = o_g * jnp.tanh(c_new)
        return (h_new, c_new), None

    h0 = jnp.zeros((B, H), jnp.float32)
    c0 = jnp.zeros((B, H), jnp.float32)
    (h_last, _), _ = jax.lax.scan(step, (h0, c0), jnp.swapaxes(x, 0, 1))
    return h_last @ fc_w + fc_b[0]


if __name__ == "__main__":
    # Shapes consistent with the module defaults: input_dim=1, hidden_dim=32,
    # num_layers=1, output_dim=1; batch=2, seq=8.
    B, T, input_dim, H, output_dim = 2, 8, 1, 32, 1

    key = jax.random.PRNGKey(0)
    keys = jax.random.split(key, 7)
    k = 1.0 / jnp.sqrt(H)   # PyTorch default uniform(-1/sqrt(H), 1/sqrt(H))

    x = jax.random.normal(keys[0], (B, T, input_dim), dtype=jnp.float32)

    w_ih = jax.random.uniform(keys[1], (input_dim, 4 * H), jnp.float32, -k, k)
    w_hh = jax.random.uniform(keys[2], (H, 4 * H), jnp.float32, -k, k)
    b_ih = jax.random.uniform(keys[3], (4 * H,), jnp.float32, -k, k)
    b_hh = jax.random.uniform(keys[4], (4 * H,), jnp.float32, -k, k)
    b = (b_ih + b_hh).reshape(1, 4 * H)

    fc_w = jax.random.uniform(keys[5], (H, output_dim), jnp.float32, -k, k)
    fc_b = jax.random.uniform(keys[6], (1, output_dim), jnp.float32, -k, k)

    out = traffic_lstm_forward(x, w_ih, w_hh, b, fc_w, fc_b)
    out = jax.block_until_ready(out)

    ref = traffic_lstm_reference(x, w_ih, w_hh, b, fc_w, fc_b)
    assert out.shape == (B, output_dim)
    # Tolerance reflects the approximate EUP reciprocal used for the sigmoid.
    assert jnp.allclose(out, ref, atol=2e-3, rtol=2e-3), (out, ref)

    print("KERNEL_OK")
</pallas_src>

<mosaic_0001>
module attributes {stable_mosaic.version = 11 : i64} {
  func.func @lstm_kernel(%arg0: memref<2x8x1xf32, #tpu.memory_space<vmem>>, %arg1: memref<1x128xf32, #tpu.memory_space<vmem>>, %arg2: memref<32x128xf32, #tpu.memory_space<vmem>>, %arg3: memref<1x128xf32, #tpu.memory_space<vmem>>, %arg4: memref<32x1xf32, #tpu.memory_space<vmem>>, %arg5: memref<1x1xf32, #tpu.memory_space<vmem>>, %arg6: memref<2x1xf32, #tpu.memory_space<vmem>>) attributes {dimension_semantics = [], scalar_prefetch = 0 : i64, scratch_operands = 0 : i64, tpu.core_type = #tpu.core_type<tc>} {
    %c0 = arith.constant 0 : index
    %c0_0 = arith.constant 0 : index
    %0 = vector.load %arg3[%c0, %c0_0] : memref<1x128xf32, #tpu.memory_space<vmem>>, vector<1x128xf32>
    %c0_1 = arith.constant 0 : index
    %c0_2 = arith.constant 0 : index
    %c0_3 = arith.constant 0 : index
    %1 = vector.load %arg0[%c0_1, %c0_2, %c0_3] : memref<2x8x1xf32, #tpu.memory_space<vmem>>, vector<2x8x1xf32>
    %c0_4 = arith.constant 0 : index
    %c0_5 = arith.constant 0 : index
    %2 = vector.load %arg1[%c0_4, %c0_5] : memref<1x128xf32, #tpu.memory_space<vmem>>, vector<1x128xf32>
    %3 = vector.shape_cast %2 : vector<1x128xf32> to vector<1x1x128xf32>
    %4 = vector.broadcast %1 : vector<2x8x1xf32> to vector<2x8x128xf32>
    %5 = vector.broadcast %3 : vector<1x1x128xf32> to vector<2x8x128xf32>
    %6 = arith.mulf %4, %5 : vector<2x8x128xf32>
    %7 = vector.shape_cast %0 : vector<1x128xf32> to vector<1x1x128xf32>
    %8 = vector.broadcast %7 : vector<1x1x128xf32> to vector<2x8x128xf32>
    %9 = arith.addf %6, %8 : vector<2x8x128xf32>
    %c0_6 = arith.constant 0 : index
    %c0_7 = arith.constant 0 : index
    %10 = vector.load %arg2[%c0_6, %c0_7] : memref<32x128xf32, #tpu.memory_space<vmem>>, vector<32x128xf32>
    %cst = arith.constant 0.000000e+00 : f32
    %11 = vector.broadcast %cst : f32 to vector<2x32xf32>
    %cst_8 = arith.constant 0.000000e+00 : f32
    %12 = vector.broadcast %cst_8 : f32 to vector<2x32xf32>
    %13 = vector.extract_strided_slice %9 {offsets = [0, 0, 0], sizes = [2, 1, 128], strides = [1, 1, 1]} : vector<2x8x128xf32> to vector<2x1x128xf32>
    %14 = vector.shape_cast %13 : vector<2x1x128xf32> to vector<2x128xf32>
    %cst_9 = arith.constant dense<0.000000e+00> : vector<2x128xf32>
    %15 = tpu.matmul %11, %10, %cst_9 {dimension_numbers = #tpu.dot_dimension_numbers<[1], [0], [0], [1], [0, 0, 1, 1], [], []>} : vector<2x32xf32>, vector<32x128xf32>, vector<2x128xf32> -> vector<2x128xf32>
    %16 = arith.addf %14, %15 : vector<2x128xf32>
    %cst_10 = arith.constant 0.000000e+00 : f32
    %17 = vector.broadcast %cst_10 : f32 to vector<2x128xf32>
    %18 = arith.subf %17, %16 : vector<2x128xf32>
    %19 = math.exp %18 : vector<2x128xf32>
    %cst_11 = arith.constant 1.000000e+00 : f32
    %20 = vector.broadcast %cst_11 : f32 to vector<2x128xf32>
    %21 = arith.addf %20, %19 : vector<2x128xf32>
    %22 = tpu.reciprocal %21 {approx = true} : vector<2x128xf32> -> vector<2x128xf32>
    %23 = math.tanh %16 : vector<2x128xf32>
    %24 = vector.extract_strided_slice %22 {offsets = [0, 0], sizes = [2, 32], strides = [1, 1]} : vector<2x128xf32> to vector<2x32xf32>
    %25 = vector.extract_strided_slice %22 {offsets = [0, 32], sizes = [2, 32], strides = [1, 1]} : vector<2x128xf32> to vector<2x32xf32>
    %26 = vector.extract_strided_slice %23 {offsets = [0, 64], sizes = [2, 32], strides = [1, 1]} : vector<2x128xf32> to vector<2x32xf32>
    %27 = vector.extract_strided_slice %22 {offsets = [0, 96], sizes = [2, 32], strides = [1, 1]} : vector<2x128xf32> to vector<2x32xf32>
    %28 = arith.mulf %25, %12 : vector<2x32xf32>
    %29 = arith.mulf %24, %26 : vector<2x32xf32>
    %30 = arith.addf %28, %29 : vector<2x32xf32>
    %31 = math.tanh %30 : vector<2x32xf32>
    %32 = arith.mulf %27, %31 : vector<2x32xf32>
    %33 = vector.extract_strided_slice %9 {offsets = [0, 1, 0], sizes = [2, 1, 128], strides = [1, 1, 1]} : vector<2x8x128xf32> to vector<2x1x128xf32>
    %34 = vector.shape_cast %33 : vector<2x1x128xf32> to vector<2x128xf32>
    %cst_12 = arith.constant dense<0.000000e+00> : vector<2x128xf32>
    %35 = tpu.matmul %32, %10, %cst_12 {dimension_numbers = #tpu.dot_dimension_numbers<[1], [0], [0], [1], [0, 0, 1, 1], [], []>} : vector<2x32xf32>, vector<32x128xf32>, vector<2x128xf32> -> vector<2x128xf32>
    %36 = arith.addf %34, %35 : vector<2x128xf32>
    %cst_13 = arith.constant 0.000000e+00 : f32
    %37 = vector.broadcast %cst_13 : f32 to vector<2x128xf32>
    %38 = arith.subf %37, %36 : vector<2x128xf32>
    %39 = math.exp %38 : vector<2x128xf32>
    %cst_14 = arith.constant 1.000000e+00 : f32
    %40 = vector.broadcast %cst_14 : f32 to vector<2x128xf32>
    %41 = arith.addf %40, %39 : vector<2x128xf32>
    %42 = tpu.reciprocal %41 {approx = true} : vector<2x128xf32> -> vector<2x128xf32>
    %43 = math.tanh %36 : vector<2x128xf32>
    %44 = vector.extract_strided_slice %42 {offsets = [0, 0], sizes = [2, 32], strides = [1, 1]} : vector<2x128xf32> to vector<2x32xf32>
    %45 = vector.extract_strided_slice %42 {offsets = [0, 32], sizes = [2, 32], strides = [1, 1]} : vector<2x128xf32> to vector<2x32xf32>
    %46 = vector.extract_strided_slice %43 {offsets = [0, 64], sizes = [2, 32], strides = [1, 1]} : vector<2x128xf32> to vector<2x32xf32>
    %47 = vector.extract_strided_slice %42 {offsets = [0, 96], sizes = [2, 32], strides = [1, 1]} : vector<2x128xf32> to vector<2x32xf32>
    %48 = arith.mulf %45, %30 : vector<2x32xf32>
    %49 = arith.mulf %44, %46 : vector<2x32xf32>
    %50 = arith.addf %48, %49 : vector<2x32xf32>
    %51 = math.tanh %50 : vector<2x32xf32>
    %52 = arith.mulf %47, %51 : vector<2x32xf32>
    %53 = vector.extract_strided_slice %9 {offsets = [0, 2, 0], sizes = [2, 1, 128], strides = [1, 1, 1]} : vector<2x8x128xf32> to vector<2x1x128xf32>
    %54 = vector.shape_cast %53 : vector<2x1x128xf32> to vector<2x128xf32>
    %cst_15 = arith.constant dense<0.000000e+00> : vector<2x128xf32>
    %55 = tpu.matmul %52, %10, %cst_15 {dimension_numbers = #tpu.dot_dimension_numbers<[1], [0], [0], [1], [0, 0, 1, 1], [], []>} : vector<2x32xf32>, vector<32x128xf32>, vector<2x128xf32> -> vector<2x128xf32>
    %56 = arith.addf %54, %55 : vector<2x128xf32>
    %cst_16 = arith.constant 0.000000e+00 : f32
    %57 = vector.broadcast %cst_16 : f32 to vector<2x128xf32>
    %58 = arith.subf %57, %56 : vector<2x128xf32>
    %59 = math.exp %58 : vector<2x128xf32>
    %cst_17 = arith.constant 1.000000e+00 : f32
    %60 = vector.broadcast %cst_17 : f32 to vector<2x128xf32>
    %61 = arith.addf %60, %59 : vector<2x128xf32>
    %62 = tpu.reciprocal %61 {approx = true} : vector<2x128xf32> -> vector<2x128xf32>
    %63 = math.tanh %56 : vector<2x128xf32>
    %64 = vector.extract_strided_slice %62 {offsets = [0, 0], sizes = [2, 32], strides = [1, 1]} : vector<2x128xf32> to vector<2x32xf32>
    %65 = vector.extract_strided_slice %62 {offsets = [0, 32], sizes = [2, 32], strides = [1, 1]} : vector<2x128xf32> to vector<2x32xf32>
    %66 = vector.extract_strided_slice %63 {offsets = [0, 64], sizes = [2, 32], strides = [1, 1]} : vector<2x128xf32> to vector<2x32xf32>
    %67 = vector.extract_strided_slice %62 {offsets = [0, 96], sizes = [2, 32], strides = [1, 1]} : vector<2x128xf32> to vector<2x32xf32>
    %68 = arith.mulf %65, %50 : vector<2x32xf32>
    %69 = arith.mulf %64, %66 : vector<2x32xf32>
    %70 = arith.addf %68, %69 : vector<2x32xf32>
    %71 = math.tanh %70 : vector<2x32xf32>
    %72 = arith.mulf %67, %71 : vector<2x32xf32>
    %73 = vector.extract_strided_slice %9 {offsets = [0, 3, 0], sizes = [2, 1, 128], strides = [1, 1, 1]} : vector<2x8x128xf32> to vector<2x1x128xf32>
    %74 = vector.shape_cast %73 : vector<2x1x128xf32> to vector<2x128xf32>
    %cst_18 = arith.constant dense<0.000000e+00> : vector<2x128xf32>
    %75 = tpu.matmul %72, %10, %cst_18 {dimension_numbers = #tpu.dot_dimension_numbers<[1], [0], [0], [1], [0, 0, 1, 1], [], []>} : vector<2x32xf32>, vector<32x128xf32>, vector<2x128xf32> -> vector<2x128xf32>
    %76 = arith.addf %74, %75 : vector<2x128xf32>
    %cst_19 = arith.constant 0.000000e+00 : f32
    %77 = vector.broadcast %cst_19 : f32 to vector<2x128xf32>
    %78 = arith.subf %77, %76 : vector<2x128xf32>
    %79 = math.exp %78 : vector<2x128xf32>
    %cst_20 = arith.constant 1.000000e+00 : f32
    %80 = vector.broadcast %cst_20 : f32 to vector<2x128xf32>
    %81 = arith.addf %80, %79 : vector<2x128xf32>
    %82 = tpu.reciprocal %81 {approx = true} : vector<2x128xf32> -> vector<2x128xf32>
    %83 = math.tanh %76 : vector<2x128xf32>
    %84 = vector.extract_strided_slice %82 {offsets = [0, 0], sizes = [2, 32], strides = [1, 1]} : vector<2x128xf32> to vector<2x32xf32>
    %85 = vector.extract_strided_slice %82 {offsets = [0, 32], sizes = [2, 32], strides = [1, 1]} : vector<2x128xf32> to vector<2x32xf32>
    %86 = vector.extract_strided_slice %83 {offsets = [0, 64], sizes = [2, 32], strides = [1, 1]} : vector<2x128xf32> to vector<2x32xf32>
    %87 = vector.extract_strided_slice %82 {offsets = [0, 96], sizes = [2, 32], strides = [1, 1]} : vector<2x128xf32> to vector<2x32xf32>
    %88 = arith.mulf %85, %70 : vector<2x32xf32>
    %89 = arith.mulf %84, %86 : vector<2x32xf32>
    %90 = arith.addf %88, %89 : vector<2x32xf32>
    %91 = math.tanh %90 : vector<2x32xf32>
    %92 = arith.mulf %87, %91 : vector<2x32xf32>
    %93 = vector.extract_strided_slice %9 {offsets = [0, 4, 0], sizes = [2, 1, 128], strides = [1, 1, 1]} : vector<2x8x128xf32> to vector<2x1x128xf32>
    %94 = vector.shape_cast %93 : vector<2x1x128xf32> to vector<2x128xf32>
    %cst_21 = arith.constant dense<0.000000e+00> : vector<2x128xf32>
    %95 = tpu.matmul %92, %10, %cst_21 {dimension_numbers = #tpu.dot_dimension_numbers<[1], [0], [0], [1], [0, 0, 1, 1], [], []>} : vector<2x32xf32>, vector<32x128xf32>, vector<2x128xf32> -> vector<2x128xf32>
    %96 = arith.addf %94, %95 : vector<2x128xf32>
    %cst_22 = arith.constant 0.000000e+00 : f32
    %97 = vector.broadcast %cst_22 : f32 to vector<2x128xf32>
    %98 = arith.subf %97, %96 : vector<2x128xf32>
    %99 = math.exp %98 : vector<2x128xf32>
    %cst_23 = arith.constant 1.000000e+00 : f32
    %100 = vector.broadcast %cst_23 : f32 to vector<2x128xf32>
    %101 = arith.addf %100, %99 : vector<2x128xf32>
    %102 = tpu.reciprocal %101 {approx = true} : vector<2x128xf32> -> vector<2x128xf32>
    %103 = math.tanh %96 : vector<2x128xf32>
    %104 = vector.extract_strided_slice %102 {offsets = [0, 0], sizes = [2, 32], strides = [1, 1]} : vector<2x128xf32> to vector<2x32xf32>
    %105 = vector.extract_strided_slice %102 {offsets = [0, 32], sizes = [2, 32], strides = [1, 1]} : vector<2x128xf32> to vector<2x32xf32>
    %106 = vector.extract_strided_slice %103 {offsets = [0, 64], sizes = [2, 32], strides = [1, 1]} : vector<2x128xf32> to vector<2x32xf32>
    %107 = vector.extract_strided_slice %102 {offsets = [0, 96], sizes = [2, 32], strides = [1, 1]} : vector<2x128xf32> to vector<2x32xf32>
    %108 = arith.mulf %105, %90 : vector<2x32xf32>
    %109 = arith.mulf %104, %106 : vector<2x32xf32>
    %110 = arith.addf %108, %109 : vector<2x32xf32>
    %111 = math.tanh %110 : vector<2x32xf32>
    %112 = arith.mulf %107, %111 : vector<2x32xf32>
    %113 = vector.extract_strided_slice %9 {offsets = [0, 5, 0], sizes = [2, 1, 128], strides = [1, 1, 1]} : vector<2x8x128xf32> to vector<2x1x128xf32>
    %114 = vector.shape_cast %113 : vector<2x1x128xf32> to vector<2x128xf32>
    %cst_24 = arith.constant dense<0.000000e+00> : vector<2x128xf32>
    %115 = tpu.matmul %112, %10, %cst_24 {dimension_numbers = #tpu.dot_dimension_numbers<[1], [0], [0], [1], [0, 0, 1, 1], [], []>} : vector<2x32xf32>, vector<32x128xf32>, vector<2x128xf32> -> vector<2x128xf32>
    %116 = arith.addf %114, %115 : vector<2x128xf32>
    %cst_25 = arith.constant 0.000000e+00 : f32
    %117 = vector.broadcast %cst_25 : f32 to vector<2x128xf32>
    %118 = arith.subf %117, %116 : vector<2x128xf32>
    %119 = math.exp %118 : vector<2x128xf32>
    %cst_26 = arith.constant 1.000000e+00 : f32
    %120 = vector.broadcast %cst_26 : f32 to vector<2x128xf32>
    %121 = arith.addf %120, %119 : vector<2x128xf32>
    %122 = tpu.reciprocal %121 {approx = true} : vector<2x128xf32> -> vector<2x128xf32>
    %123 = math.tanh %116 : vector<2x128xf32>
    %124 = vector.extract_strided_slice %122 {offsets = [0, 0], sizes = [2, 32], strides = [1, 1]} : vector<2x128xf32> to vector<2x32xf32>
    %125 = vector.extract_strided_slice %122 {offsets = [0, 32], sizes = [2, 32], strides = [1, 1]} : vector<2x128xf32> to vector<2x32xf32>
    %126 = vector.extract_strided_slice %123 {offsets = [0, 64], sizes = [2, 32], strides = [1, 1]} : vector<2x128xf32> to vector<2x32xf32>
    %127 = vector.extract_strided_slice %122 {offsets = [0, 96], sizes = [2, 32], strides = [1, 1]} : vector<2x128xf32> to vector<2x32xf32>
    %128 = arith.mulf %125, %110 : vector<2x32xf32>
    %129 = arith.mulf %124, %126 : vector<2x32xf32>
    %130 = arith.addf %128, %129 : vector<2x32xf32>
    %131 = math.tanh %130 : vector<2x32xf32>
    %132 = arith.mulf %127, %131 : vector<2x32xf32>
    %133 = vector.extract_strided_slice %9 {offsets = [0, 6, 0], sizes = [2, 1, 128], strides = [1, 1, 1]} : vector<2x8x128xf32> to vector<2x1x128xf32>
    %134 = vector.shape_cast %133 : vector<2x1x128xf32> to vector<2x128xf32>
    %cst_27 = arith.constant dense<0.000000e+00> : vector<2x128xf32>
    %135 = tpu.matmul %132, %10, %cst_27 {dimension_numbers = #tpu.dot_dimension_numbers<[1], [0], [0], [1], [0, 0, 1, 1], [], []>} : vector<2x32xf32>, vector<32x128xf32>, vector<2x128xf32> -> vector<2x128xf32>
    %136 = arith.addf %134, %135 : vector<2x128xf32>
    %cst_28 = arith.constant 0.000000e+00 : f32
    %137 = vector.broadcast %cst_28 : f32 to vector<2x128xf32>
    %138 = arith.subf %137, %136 : vector<2x128xf32>
    %139 = math.exp %138 : vector<2x128xf32>
    %cst_29 = arith.constant 1.000000e+00 : f32
    %140 = vector.broadcast %cst_29 : f32 to vector<2x128xf32>
    %141 = arith.addf %140, %139 : vector<2x128xf32>
    %142 = tpu.reciprocal %141 {approx = true} : vector<2x128xf32> -> vector<2x128xf32>
    %143 = math.tanh %136 : vector<2x128xf32>
    %144 = vector.extract_strided_slice %142 {offsets = [0, 0], sizes = [2, 32], strides = [1, 1]} : vector<2x128xf32> to vector<2x32xf32>
    %145 = vector.extract_strided_slice %142 {offsets = [0, 32], sizes = [2, 32], strides = [1, 1]} : vector<2x128xf32> to vector<2x32xf32>
    %146 = vector.extract_strided_slice %143 {offsets = [0, 64], sizes = [2, 32], strides = [1, 1]} : vector<2x128xf32> to vector<2x32xf32>
    %147 = vector.extract_strided_slice %142 {offsets = [0, 96], sizes = [2, 32], strides = [1, 1]} : vector<2x128xf32> to vector<2x32xf32>
    %148 = arith.mulf %145, %130 : vector<2x32xf32>
    %149 = arith.mulf %144, %146 : vector<2x32xf32>
    %150 = arith.addf %148, %149 : vector<2x32xf32>
    %151 = math.tanh %150 : vector<2x32xf32>
    %152 = arith.mulf %147, %151 : vector<2x32xf32>
    %153 = vector.extract_strided_slice %9 {offsets = [0, 7, 0], sizes = [2, 1, 128], strides = [1, 1, 1]} : vector<2x8x128xf32> to vector<2x1x128xf32>
    %154 = vector.shape_cast %153 : vector<2x1x128xf32> to vector<2x128xf32>
    %cst_30 = arith.constant dense<0.000000e+00> : vector<2x128xf32>
    %155 = tpu.matmul %152, %10, %cst_30 {dimension_numbers = #tpu.dot_dimension_numbers<[1], [0], [0], [1], [0, 0, 1, 1], [], []>} : vector<2x32xf32>, vector<32x128xf32>, vector<2x128xf32> -> vector<2x128xf32>
    %156 = arith.addf %154, %155 : vector<2x128xf32>
    %cst_31 = arith.constant 0.000000e+00 : f32
    %157 = vector.broadcast %cst_31 : f32 to vector<2x128xf32>
    %158 = arith.subf %157, %156 : vector<2x128xf32>
    %159 = math.exp %158 : vector<2x128xf32>
    %cst_32 = arith.constant 1.000000e+00 : f32
    %160 = vector.broadcast %cst_32 : f32 to vector<2x128xf32>
    %161 = arith.addf %160, %159 : vector<2x128xf32>
    %162 = tpu.reciprocal %161 {approx = true} : vector<2x128xf32> -> vector<2x128xf32>
    %163 = math.tanh %156 : vector<2x128xf32>
    %164 = vector.extract_strided_slice %162 {offsets = [0, 0], sizes = [2, 32], strides = [1, 1]} : vector<2x128xf32> to vector<2x32xf32>
    %165 = vector.extract_strided_slice %162 {offsets = [0, 32], sizes = [2, 32], strides = [1, 1]} : vector<2x128xf32> to vector<2x32xf32>
    %166 = vector.extract_strided_slice %163 {offsets = [0, 64], sizes = [2, 32], strides = [1, 1]} : vector<2x128xf32> to vector<2x32xf32>
    %167 = vector.extract_strided_slice %162 {offsets = [0, 96], sizes = [2, 32], strides = [1, 1]} : vector<2x128xf32> to vector<2x32xf32>
    %168 = arith.mulf %165, %150 : vector<2x32xf32>
    %169 = arith.mulf %164, %166 : vector<2x32xf32>
    %170 = arith.addf %168, %169 : vector<2x32xf32>
    %171 = math.tanh %170 : vector<2x32xf32>
    %172 = arith.mulf %167, %171 : vector<2x32xf32>
    %c0_33 = arith.constant 0 : index
    %c0_34 = arith.constant 0 : index
    %173 = vector.load %arg4[%c0_33, %c0_34] : memref<32x1xf32, #tpu.memory_space<vmem>>, vector<32x1xf32>
    %cst_35 = arith.constant dense<0.000000e+00> : vector<2x1xf32>
    %174 = tpu.matmul %172, %173, %cst_35 {dimension_numbers = #tpu.dot_dimension_numbers<[1], [0], [0], [1], [0, 0, 1, 1], [], []>} : vector<2x32xf32>, vector<32x1xf32>, vector<2x1xf32> -> vector<2x1xf32>
    %c0_36 = arith.constant 0 : index
    %c0_37 = arith.constant 0 : index
    %175 = vector.load %arg5[%c0_36, %c0_37] : memref<1x1xf32, #tpu.memory_space<vmem>>, vector<1x1xf32>
    %176 = vector.broadcast %175 : vector<1x1xf32> to vector<2x1xf32>
    %177 = arith.addf %174, %176 : vector<2x1xf32>
    %c0_38 = arith.constant 0 : index
    %c0_39 = arith.constant 0 : index
    %178 = vector.load %arg6[%c0_38, %c0_39] : memref<2x1xf32, #tpu.memory_space<vmem>>, vector<2x1xf32>
    tpu.vector_store %arg6[%c0_38, %c0_39], %177 {strides = array<i32>} : memref<2x1xf32, #tpu.memory_space<vmem>>, vector<2x1xf32>,
    return
  }
}

</mosaic_0001>

<bundles_post_ra>
// kernel: tpu_custom_call.1
= control target key start
LH: loop header
LB: loop body
LE: loop exit
PB: predicated region body
PF: predicated region fallthrough
CT: control target
= control target key end

     0   :  { %v1534_v0 = vmov 0.0   ;;  %vm1535_vm0 = vmmov 0   ;;  %v1536_v3 = vmov 0   ;;  %vm188_vm1 = vcmask 1041409   ;;  %s1815_s2 = inlined_call_operand.vmem [shape: f32[32,128], index: 2, kind: input, shape index: {}]   ;;  %s1816_s0 = inlined_call_operand.vmem [shape: f32[2,8,1], index: 0, kind: input, shape index: {}]   ;;  %s1817_s1 = inlined_call_operand.vmem [shape: f32[1,128], index: 1, kind: input, shape index: {}]   ;;  %s1818_s3 = inlined_call_operand.vmem [shape: f32[1,128], index: 3, kind: input, shape index: {}]   ;;  %s1819_s4 = inlined_call_operand.vmem [shape: f32[32,1], index: 4, kind: input, shape index: {}]   ;;  %s1820_s5 = inlined_call_operand.<no memory space> [shape: f32[1,1], index: 5, kind: input, shape index: {}]   ;;  %s1821_s6 = inlined_call_operand.vmem [shape: f32[2,1], index: 6, kind: output, shape index: {}]  }
   0x1   :  { %1301 = vmatprep.subr.mxu0 %v1534_v0  ;;  %v1578_v1 = vld [vmem:[%s1815_s2 + $0x18] sm:$0xff]  ;;  %v1583_v2 = vld [vmem:[%s1815_s2 + $0x10] sm:$0xff]  ;;  %1309 = vmatprep.mubr.msk.f32.mxu0 %vm1535_vm0, %v1534_v0  ;;  %v27_v4 = vld [vmem:[%s1816_s0 + $0x8] sm:$0xff]  ;;  %vm59_vm2 = vcmask 261120   ;;  %vm1239_vm3 = vcmask 1024  }
   0x2   :  { %1302 = vmatpush3.msra.mxu0 %v1578_v1  ;;  %1405 = vset.pattern.permute.xlu0 %v1536_v3  ;;  %v1595_v5 = vld [vmem:[%s1815_s2 + $0x8] sm:$0xff]  ;;  %v26_v6 = vld [vmem:[%s1816_s0] sm:$0xff] }
   0x3   :  { %1303 = vmatprep.subr.mxu0 %v1534_v0  ;;  %36 = vperm.xlu0 %1405, %v27_v4   ;;  %v1606_v7 = vld [vmem:[%s1815_s2] sm:$0xff] }
   0x4   :  { %1304 = vmatpush3.msra.mxu0 %v1583_v2  ;;  %1312 = vmatprep.subr.mxu1 %v1534_v0  ;;  %v1245_v9 = vld [vmem:[%s1817_s1] ss:$0 sm:$0xff]  ;;  %s1537_s1 = smov 64  }
   0x5   :  { %1305 = vmatprep.subr.mxu0 %v1534_v0  ;;  %1313 = vmatpush3.msra.mxu1 %v1578_v1  ;;  %v1246_v13 = vld [vmem:[%s1818_s3] ss:$0 sm:$0xff]  ;;  %s1538_s3 = smov 32  }
   0x6   :  { %1306 = vmatpush3.msra.mxu0 %v1595_v5  ;;  %1314 = vmatprep.subr.mxu1 %v1534_v0 }
   0x7   :  { %1307 = vmatprep.subr.mxu0 %v1534_v0  ;;  %31 = vperm.xlu0 %1405, %v26_v6  }
   0x8   :  { %1308 = vmatpush3.msra.mxu0 %v1606_v7  ;;  %1315 = vmatpush3.msra.mxu1 %v1583_v2 }
   0x9   :  { %1310 = vmatmul.mubr.f32.vlgmr.msra.gmra.mxu0 %v1534_v0  ;;  %1316 = vmatprep.subr.mxu1 %v1534_v0 }
   0xa   :  { %1317 = vmatpush3.msra.mxu1 %v1595_v5  ;;  %1320 = vmatprep.mubr.msk.f32.mxu1 %vm1535_vm0, %v1534_v0 }
   0xb   :  { %1318 = vmatprep.subr.mxu1 %v1534_v0  ;;  %1323 = vmatprep.subr.mxu0 %v1534_v0 }
   0xc   :  { %1319 = vmatpush3.msra.mxu1 %v1606_v7  ;;  %1324 = vmatpush3.msra.mxu0 %v1578_v1 }
   0xd   :  { %1325 = vmatprep.subr.mxu0 %v1534_v0  ;;  %1331 = vmatprep.mubr.msk.f32.mxu0 %vm1535_vm0, %v1534_v0 }
   0xe   :  { %1326 = vmatpush3.msra.mxu0 %v1583_v2  ;;  %1334 = vmatprep.subr.mxu1 %v1534_v0 }
   0xf   :  { %1327 = vmatprep.subr.mxu0 %v1534_v0 }
  0x10   :  { %1328 = vmatpush3.msra.mxu0 %v1595_v5 }
  0x11   :  { %1329 = vmatprep.subr.mxu0 %v1534_v0 }
  0x12   :  { %1330 = vmatpush3.msra.mxu0 %v1606_v7 }
  0x13   :  { %1345 = vmatprep.subr.mxu0 %v1534_v0 }
  0x7e   :  { %v37_v8 = vpop.permute.xlu0 %36 }
  0x7f   :  { %v46_v11 = vmul.f32 %v1245_v9, %v37_v8 }
  0x81   :  { %v1639_v14 = vadd.f32 %v1246_v13, %v46_v11 }
  0x82   :  { %v32_v10 = vpop.permute.xlu0 %31 }
  0x83   :  { %v45_v12 = vmul.f32 %v1245_v9, %v32_v10 }
  0x85   :  { %v1641_v16 = vadd.f32 %v1246_v13, %v45_v12 }
  0xc9   :  { %v129_v15 = vpop.f32.mrf.mxu0 }
  0xca   :  { %v134_v17 = vrot.slane %v129_v15, 1  ;;  %v137_v20 = vadd.f32 %v129_v15, %v1641_v16 }
  0xcb   :  { %v1311_v18 = vpop.f32.mrf.mxu0 }
  0xcc   :  { %v138_v19 = vadd.f32 %v134_v17, %v1639_v14  ;;  %v139_v24 = vsub.f32 0.0, %v137_v20 }
  0xce   :  { %1406 = vtanh.f32 %v138_v19  ;;  %v140_v23 = vsub.f32 0.0, %v138_v19  ;;  %v141_v26 = vmul.f32 1.442695, %v139_v24 }
  0xcf   :  { %1408 = vtanh.f32 %v137_v20 }
  0xd0   :  { %v143_v25 = vmul.f32 1.442695, %v140_v23 }
  0xd2   :  { %1410 = vpow2.f32 %v143_v25 }
  0xd3   :  { %1412 = vpow2.f32 %v141_v26 }
  0xdb   :  { %v1407_v21 = vpop.eup %1406 }
  0xdc   :  { %157 = vrot.lane.b32.xlu1 %v1407_v21, %s1537_s1  ;;  %v1409_v22 = vpop.eup %1408 }
  0xdf   :  { %v1411_v27 = vpop.eup %1410 }
  0xe0   :  { %155 = vrot.lane.b32.xlu1 %v1409_v22, %s1537_s1  ;;  %v146_v28 = vadd.f32 1.0, %v1411_v27  ;;  %v1413_v29 = vpop.eup %1412 }
  0xe1   :  { %v145_v30 = vadd.f32 1.0, %v1413_v29 }
  0xe2   :  { %1414 = vrcp.f32 %v146_v28 }
  0xe3   :  { %1416 = vrcp.f32 %v145_v30 }
  0xef   :  { %v1415_v31 = vpop.eup %1414 }
  0xf0   :  { %v1417_v34 = vpop.eup %1416  ;;  %v152_v37 = vmul.f32 0.0, %v1415_v31 }
  0xf1   :  { %v151_v40 = vmul.f32 0.0, %v1417_v34 }
 0x14e   :  { %v158_v32 = vpop.permute.xlu1 %157 }
 0x14f   :  { %v162_v33 = vmul.f32 %v1415_v31, %v158_v32 }
 0x151   :  { %167 = vrot.lane.b32.xlu0 %v162_v33, %s1538_s3 }
 0x152   :  { %v156_v35 = vpop.permute.xlu1 %155 }
 0x153   :  { %v161_v36 = vmul.f32 %v1417_v34, %v156_v35 }
 0x155   :  { %165 = vrot.lane.b32.xlu1 %v161_v36, %s1538_s3 }
 0x1c3   :  { %v168_v38 = vpop.permute.xlu0 %167 }
 0x1c4   :  { %v1649_v39 = vadd.f32 %v168_v38, %v152_v37 }
 0x1c6   :  { %1418 = vtanh.f32 %v1649_v39  ;;  %v285_v15 = vrot.slane %v1649_v39, 7 }
 0x1c7   :  { %v166_v41 = vpop.permute.xlu1 %165 }
 0x1c8   :  { %v1652_v42 = vadd.f32 %v166_v41, %v151_v40 }
 0x1ca   :  { %1420 = vtanh.f32 %v1652_v42  ;;  %v284_v17 = vrot.slane %v1652_v42, 7 }
 0x1d3   :  { %v1419_v43 = vpop.eup %1418 }
 0x1d4   :  { %179 = vrot.lane.b32.xlu0 %v1419_v43, %s1537_s1 }
 0x1d7   :  { %v1421_v44 = vpop.eup %1420 }
 0x1d8   :  { %177 = vrot.lane.b32.xlu1 %v1421_v44, %s1537_s1 }
 0x246   :  { %v180_v45 = vpop.permute.xlu0 %179 }
 0x247   :  { %v184_v46 = vmul.f32 %v1415_v31, %v180_v45 }
 0x249   :  { %v187_v48 = vrot.slane %v184_v46, 7 }
 0x24a   :  { %v178_v47 = vpop.permute.xlu1 %177 }
 0x24b   :  { %v183_v49 = vmul.f32 %v1417_v34, %v178_v47 }
 0x24d   :  { %v189_v50 = vsel %vm188_vm1, %v187_v48, %v183_v49 }
 0x24e   :  { %190 = vrot.lane.b32.xlu0 %v189_v50, %s1538_s3 }
 0x2c0   :  { %v191_v51 = vpop.permute.xlu0 %190 }
 0x2c1   :  { %1321 = vmatmul.mubr.msk.f32.vlgmr.msra.gmra.mxu1 %vm59_vm2, %v191_v51 }
 0x2c2   :  { %1335 = vmatpush3.msra.mxu1 %v1578_v1  ;;  %1342 = vmatprep.mubr.msk.f32.mxu1 %vm1535_vm0, %v1534_v0 }
 0x2c3   :  { %1336 = vmatprep.subr.mxu1 %v1534_v0 }
 0x2c4   :  { %1337 = vmatpush3.msra.mxu1 %v1583_v2 }
 0x2c5   :  { %1338 = vmatprep.subr.mxu1 %v1534_v0 }
 0x2c6   :  { %1339 = vmatpush3.msra.mxu1 %v1595_v5 }
 0x2c7   :  { %1340 = vmatprep.subr.mxu1 %v1534_v0 }
 0x2c8   :  { %1341 = vmatpush3.msra.mxu1 %v1606_v7 }
 0x2c9   :  { %1356 = vmatprep.subr.mxu1 %v1534_v0 }
 0x381   :  { %v260_v52 = vpop.f32.mrf.mxu1 }
 0x382   :  { %v265_v53 = vrot.slane %v260_v52, 7  ;;  %v269_v54 = vadd.f32 %v260_v52, %v1639_v14 }
 0x383   :  { %v1322_v55 = vpop.f32.mrf.mxu1 }
 0x384   :  { %v268_v56 = vadd.f32 %v265_v53, %v1641_v16  ;;  %1422 = vtanh.f32 %v269_v54  ;;  %v271_v59 = vsub.f32 0.0, %v269_v54 }
 0x386   :  { %1424 = vtanh.f32 %v268_v56  ;;  %v270_v60 = vsub.f32 0.0, %v268_v56  ;;  %v274_v61 = vmul.f32 1.442695, %v271_v59 }
 0x388   :  { %v272_v62 = vmul.f32 1.442695, %v270_v60  ;;  %1426 = vpow2.f32 %v274_v61 }
 0x38a   :  { %1428 = vpow2.f32 %v272_v62 }
 0x391   :  { %v1423_v57 = vpop.eup %1422 }
 0x392   :  { %294 = vrot.lane.b32.xlu0 %v1423_v57, %s1537_s1 }
 0x393   :  { %v1425_v58 = vpop.eup %1424 }
 0x394   :  { %292 = vrot.lane.b32.xlu1 %v1425_v58, %s1537_s1 }
 0x395   :  { %v1427_v63 = vpop.eup %1426 }
 0x396   :  { %v277_v4 = vadd.f32 1.0, %v1427_v63 }
 0x397   :  { %v1429_v3 = vpop.eup %1428 }
 0x398   :  { %v276_v6 = vadd.f32 1.0, %v1429_v3  ;;  %1430 = vrcp.f32 %v277_v4 }
 0x39a   :  { %1432 = vrcp.f32 %v276_v6 }
 0x3a5   :  { %v1431_v8 = vpop.eup %1430 }
 0x3a6   :  { %v289_v18 = vmul.f32 %v1431_v8, %v285_v15 }
 0x3a7   :  { %v1433_v11 = vpop.eup %1432 }
 0x3a8   :  { %v288_v21 = vmul.f32 %v1433_v11, %v284_v17 }
 0x404   :  { %v295_v9 = vpop.permute.xlu0 %294 }
 0x405   :  { %v299_v10 = vmul.f32 %v1431_v8, %v295_v9 }
 0x406   :  { %v293_v12 = vpop.permute.xlu1 %292 }
 0x407   :  { %v298_v13 = vmul.f32 %v1433_v11, %v293_v12  ;;  %304 = vrot.lane.b32.xlu0 %v299_v10, %s1538_s3 }
 0x409   :  { %302 = vrot.lane.b32.xlu1 %v298_v13, %s1538_s3 }
 0x479   :  { %v305_v19 = vpop.permute.xlu0 %304 }
 0x47a   :  { %v1678_v20 = vadd.f32 %v305_v19, %v289_v18 }
 0x47b   :  { %v303_v22 = vpop.permute.xlu1 %302 }
 0x47c   :  { %1434 = vtanh.f32 %v1678_v20  ;;  %v308_v23 = vadd.f32 %v303_v22, %v288_v21  ;;  %v422_v56 = vrot.slane %v1678_v20, 7 }
 0x47e   :  { %1436 = vtanh.f32 %v308_v23  ;;  %v421_v55 = vrot.slane %v308_v23, 7 }
 0x489   :  { %v1435_v24 = vpop.eup %1434 }
 0x48a   :  { %316 = vrot.lane.b32.xlu0 %v1435_v24, %s1537_s1 }
 0x48b   :  { %v1437_v25 = vpop.eup %1436 }
 0x48c   :  { %314 = vrot.lane.b32.xlu1 %v1437_v25, %s1537_s1 }
 0x4fc   :  { %v317_v26 = vpop.permute.xlu0 %316 }
 0x4fd   :  { %v321_v29 = vmul.f32 %v1431_v8, %v317_v26 }
 0x4fe   :  { %v315_v27 = vpop.permute.xlu1 %314 }
 0x4ff   :  { %v320_v28 = vmul.f32 %v1433_v11, %v315_v27 }
 0x501   :  { %v324_v30 = vrot.slane %v320_v28, 1 }
 0x503   :  { %v325_v31 = vsel %vm188_vm1, %v321_v29, %v324_v30 }
 0x504   :  { %326 = vrot.lane.b32.xlu1 %v325_v31, %s1538_s3 }
 0x576   :  { %v327_v32 = vpop.permute.xlu1 %326 }
 0x577   :  { %1332 = vmatmul.mubr.msk.f32.vlgmr.msra.gmra.mxu0 %vm59_vm2, %v327_v32 }
 0x578   :  { %1346 = vmatpush3.msra.mxu0 %v1578_v1  ;;  %1353 = vmatprep.mubr.msk.f32.mxu0 %vm1535_vm0, %v1534_v0 }
 0x579   :  { %1347 = vmatprep.subr.mxu0 %v1534_v0 }
 0x57a   :  { %1348 = vmatpush3.msra.mxu0 %v1583_v2 }
 0x57b   :  { %1349 = vmatprep.subr.mxu0 %v1534_v0 }
 0x57c   :  { %1350 = vmatpush3.msra.mxu0 %v1595_v5 }
 0x57d   :  { %1351 = vmatprep.subr.mxu0 %v1534_v0 }
 0x57e   :  { %1352 = vmatpush3.msra.mxu0 %v1606_v7 }
 0x57f   :  { %1367 = vmatprep.subr.mxu0 %v1534_v0 }
 0x637   :  { %v396_v33 = vpop.f32.mrf.mxu0 }
 0x638   :  { %v401_v34 = vrot.slane %v396_v33, 6  ;;  %v402_v35 = vrot.slane %v396_v33, 7 }
 0x639   :  { %v1333_v36 = vpop.f32.mrf.mxu0 }
 0x63a   :  { %v405_v37 = vadd.f32 %v401_v34, %v1641_v16  ;;  %v406_v38 = vadd.f32 %v402_v35, %v1639_v14 }
 0x63c   :  { %1438 = vtanh.f32 %v405_v37  ;;  %v407_v41 = vsub.f32 0.0, %v405_v37  ;;  %v408_v42 = vsub.f32 0.0, %v406_v38 }
 0x63d   :  { %1440 = vtanh.f32 %v406_v38 }
 0x63e   :  { %v409_v43 = vmul.f32 1.442695, %v407_v41  ;;  %v411_v44 = vmul.f32 1.442695, %v408_v42 }
 0x640   :  { %1442 = vpow2.f32 %v409_v43 }
 0x641   :  { %1444 = vpow2.f32 %v411_v44 }
 0x649   :  { %v1439_v39 = vpop.eup %1438 }
 0x64a   :  { %v1441_v40 = vpop.eup %1440  ;;  %429 = vrot.lane.b32.xlu0 %v1439_v39, %s1537_s1 }
 0x64b   :  { %431 = vrot.lane.b32.xlu1 %v1441_v40, %s1537_s1 }
 0x64d   :  { %v1443_v45 = vpop.eup %1442 }
 0x64e   :  { %v1445_v46 = vpop.eup %1444  ;;  %v413_v47 = vadd.f32 1.0, %v1443_v45 }
 0x64f   :  { %v414_v48 = vadd.f32 1.0, %v1445_v46 }
 0x650   :  { %1446 = vrcp.f32 %v413_v47 }
 0x651   :  { %1448 = vrcp.f32 %v414_v48 }
 0x65d   :  { %v1447_v49 = vpop.eup %1446 }
 0x65e   :  { %v1449_v51 = vpop.eup %1448  ;;  %v425_v57 = vmul.f32 %v1447_v49, %v421_v55 }
 0x65f   :  { %v426_v58 = vmul.f32 %v1449_v51, %v422_v56 }
 0x6bc   :  { %v430_v50 = vpop.permute.xlu0 %429 }
 0x6bd   :  { %v432_v52 = vpop.permute.xlu1 %431  ;;  %v435_v53 = vmul.f32 %v1447_v49, %v430_v50 }
 0x6be   :  { %v436_v54 = vmul.f32 %v1449_v51, %v432_v52 }
 0x6bf   :  { %439 = vrot.lane.b32.xlu0 %v435_v53, %s1538_s3 }
 0x6c0   :  { %441 = vrot.lane.b32.xlu1 %v436_v54, %s1538_s3 }
 0x731   :  { %v440_v59 = vpop.permute.xlu0 %439 }
 0x732   :  { %v442_v60 = vpop.permute.xlu1 %441  ;;  %v445_v61 = vadd.f32 %v440_v59, %v425_v57 }
 0x733   :  { %v446_v62 = vadd.f32 %v442_v60, %v426_v58 }
 0x734   :  { %1450 = vtanh.f32 %v445_v61  ;;  %v559_v38 = vrot.slane %v445_v61, 7 }
 0x735   :  { %1452 = vtanh.f32 %v446_v62  ;;  %v560_v39 = vrot.slane %v446_v62, 7 }
 0x741   :  { %v1451_v63 = vpop.eup %1450 }
 0x742   :  { %v1453_v3 = vpop.eup %1452  ;;  %451 = vrot.lane.b32.xlu0 %v1451_v63, %s1537_s1 }
 0x743   :  { %453 = vrot.lane.b32.xlu1 %v1453_v3, %s1537_s1 }
 0x7b4   :  { %v452_v4 = vpop.permute.xlu0 %451 }
 0x7b5   :  { %v454_v6 = vpop.permute.xlu1 %453  ;;  %v457_v8 = vmul.f32 %v1447_v49, %v452_v4 }
 0x7b6   :  { %v458_v9 = vmul.f32 %v1449_v51, %v454_v6 }
 0x7b7   :  { %v461_v10 = vrot.slane %v457_v8, 2 }
 0x7b8   :  { %v462_v11 = vrot.slane %v458_v9, 1 }
 0x7ba   :  { %v463_v12 = vsel %vm188_vm1, %v462_v11, %v461_v10 }
 0x7bb   :  { %464 = vrot.lane.b32.xlu0 %v463_v12, %s1538_s3 }
 0x82d   :  { %v465_v13 = vpop.permute.xlu0 %464 }
 0x82e   :  { %1343 = vmatmul.mubr.msk.f32.vlgmr.msra.gmra.mxu1 %vm59_vm2, %v465_v13 }
 0x82f   :  { %1357 = vmatpush3.msra.mxu1 %v1578_v1  ;;  %1364 = vmatprep.mubr.msk.f32.mxu1 %vm1535_vm0, %v1534_v0 }
 0x830   :  { %1358 = vmatprep.subr.mxu1 %v1534_v0 }
 0x831   :  { %1359 = vmatpush3.msra.mxu1 %v1583_v2 }
 0x832   :  { %1360 = vmatprep.subr.mxu1 %v1534_v0 }
 0x833   :  { %1361 = vmatpush3.msra.mxu1 %v1595_v5 }
 0x834   :  { %1362 = vmatprep.subr.mxu1 %v1534_v0 }
 0x835   :  { %1363 = vmatpush3.msra.mxu1 %v1606_v7 }
 0x836   :  { %1378 = vmatprep.subr.mxu1 %v1534_v0 }
 0x8ee   :  { %v534_v15 = vpop.f32.mrf.mxu1 }
 0x8ef   :  { %v539_v17 = vrot.slane %v534_v15, 5  ;;  %v540_v18 = vrot.slane %v534_v15, 6 }
 0x8f0   :  { %v1344_v19 = vpop.f32.mrf.mxu1 }
 0x8f1   :  { %v543_v20 = vadd.f32 %v539_v17, %v1641_v16  ;;  %v544_v21 = vadd.f32 %v540_v18, %v1639_v14 }
 0x8f3   :  { %1454 = vtanh.f32 %v543_v20  ;;  %v545_v24 = vsub.f32 0.0, %v543_v20  ;;  %v546_v25 = vsub.f32 0.0, %v544_v21 }
 0x8f4   :  { %1456 = vtanh.f32 %v544_v21 }
 0x8f5   :  { %v547_v26 = vmul.f32 1.442695, %v545_v24  ;;  %v549_v27 = vmul.f32 1.442695, %v546_v25 }
 0x8f7   :  { %1458 = vpow2.f32 %v547_v26 }
 0x8f8   :  { %1460 = vpow2.f32 %v549_v27 }
 0x900   :  { %v1455_v22 = vpop.eup %1454 }
 0x901   :  { %v1457_v23 = vpop.eup %1456  ;;  %567 = vrot.lane.b32.xlu1 %v1455_v22, %s1537_s1 }
 0x902   :  { %569 = vrot.lane.b32.xlu0 %v1457_v23, %s1537_s1 }
 0x904   :  { %v1459_v28 = vpop.eup %1458 }
 0x905   :  { %v1461_v29 = vpop.eup %1460  ;;  %v551_v30 = vadd.f32 1.0, %v1459_v28 }
 0x906   :  { %v552_v31 = vadd.f32 1.0, %v1461_v29 }
 0x907   :  { %1462 = vrcp.f32 %v551_v30 }
 0x908   :  { %1464 = vrcp.f32 %v552_v31 }
 0x914   :  { %v1463_v32 = vpop.eup %1462 }
 0x915   :  { %v1465_v34 = vpop.eup %1464  ;;  %v563_v40 = vmul.f32 %v1463_v32, %v559_v38 }
 0x916   :  { %v564_v41 = vmul.f32 %v1465_v34, %v560_v39 }
 0x973   :  { %v568_v33 = vpop.permute.xlu1 %567 }
 0x974   :  { %v570_v35 = vpop.permute.xlu0 %569  ;;  %v573_v36 = vmul.f32 %v1463_v32, %v568_v33 }
 0x975   :  { %v574_v37 = vmul.f32 %v1465_v34, %v570_v35 }
 0x976   :  { %577 = vrot.lane.b32.xlu1 %v573_v36, %s1538_s3 }
 0x977   :  { %579 = vrot.lane.b32.xlu0 %v574_v37, %s1538_s3 }
 0x9e8   :  { %v578_v42 = vpop.permute.xlu1 %577 }
 0x9e9   :  { %v580_v43 = vpop.permute.xlu0 %579  ;;  %v583_v44 = vadd.f32 %v578_v42, %v563_v40 }
 0x9ea   :  { %v584_v45 = vadd.f32 %v580_v43, %v564_v41 }
 0x9eb   :  { %1466 = vtanh.f32 %v583_v44  ;;  %v697_v21 = vrot.slane %v583_v44, 7 }
 0x9ec   :  { %1468 = vtanh.f32 %v584_v45  ;;  %v698_v22 = vrot.slane %v584_v45, 7 }
 0x9f8   :  { %v1467_v46 = vpop.eup %1466 }
 0x9f9   :  { %v1469_v47 = vpop.eup %1468  ;;  %589 = vrot.lane.b32.xlu1 %v1467_v46, %s1537_s1 }
 0x9fa   :  { %591 = vrot.lane.b32.xlu0 %v1469_v47, %s1537_s1 }
 0xa6b   :  { %v590_v48 = vpop.permute.xlu1 %589 }
 0xa6c   :  { %v592_v49 = vpop.permute.xlu0 %591  ;;  %v595_v50 = vmul.f32 %v1463_v32, %v590_v48 }
 0xa6d   :  { %v596_v51 = vmul.f32 %v1465_v34, %v592_v49 }
 0xa6e   :  { %v599_v52 = vrot.slane %v595_v50, 3 }
 0xa6f   :  { %v600_v53 = vrot.slane %v596_v51, 2 }
 0xa71   :  { %v601_v54 = vsel %vm188_vm1, %v600_v53, %v599_v52 }
 0xa72   :  { %602 = vrot.lane.b32.xlu1 %v601_v54, %s1538_s3 }
 0xae4   :  { %v603_v55 = vpop.permute.xlu1 %602 }
 0xae5   :  { %1354 = vmatmul.mubr.msk.f32.vlgmr.msra.gmra.mxu0 %vm59_vm2, %v603_v55 }
 0xae6   :  { %1368 = vmatpush3.msra.mxu0 %v1578_v1  ;;  %1375 = vmatprep.mubr.msk.f32.mxu0 %vm1535_vm0, %v1534_v0 }
 0xae7   :  { %1369 = vmatprep.subr.mxu0 %v1534_v0 }
 0xae8   :  { %1370 = vmatpush3.msra.mxu0 %v1583_v2 }
 0xae9   :  { %1371 = vmatprep.subr.mxu0 %v1534_v0 }
 0xaea   :  { %1372 = vmatpush3.msra.mxu0 %v1595_v5 }
 0xaeb   :  { %1373 = vmatprep.subr.mxu0 %v1534_v0 }
 0xaec   :  { %1374 = vmatpush3.msra.mxu0 %v1606_v7 }
 0xaed   :  { %1389 = vmatprep.subr.mxu0 %v1534_v0 }
 0xba5   :  { %v672_v56 = vpop.f32.mrf.mxu0 }
 0xba6   :  { %v677_v57 = vrot.slane %v672_v56, 4  ;;  %v678_v58 = vrot.slane %v672_v56, 5 }
 0xba7   :  { %v1355_v59 = vpop.f32.mrf.mxu0 }
 0xba8   :  { %v681_v60 = vadd.f32 %v677_v57, %v1641_v16  ;;  %v682_v61 = vadd.f32 %v678_v58, %v1639_v14 }
 0xbaa   :  { %1470 = vtanh.f32 %v681_v60  ;;  %v683_v3 = vsub.f32 0.0, %v681_v60  ;;  %v684_v4 = vsub.f32 0.0, %v682_v61 }
 0xbab   :  { %1472 = vtanh.f32 %v682_v61 }
 0xbac   :  { %v685_v6 = vmul.f32 1.442695, %v683_v3  ;;  %v687_v8 = vmul.f32 1.442695, %v684_v4 }
 0xbae   :  { %1474 = vpow2.f32 %v685_v6 }
 0xbaf   :  { %1476 = vpow2.f32 %v687_v8 }
 0xbb7   :  { %v1471_v62 = vpop.eup %1470 }
 0xbb8   :  { %v1473_v63 = vpop.eup %1472  ;;  %705 = vrot.lane.b32.xlu0 %v1471_v62, %s1537_s1 }
 0xbb9   :  { %707 = vrot.lane.b32.xlu1 %v1473_v63, %s1537_s1 }
 0xbbb   :  { %v1475_v9 = vpop.eup %1474 }
 0xbbc   :  { %v1477_v10 = vpop.eup %1476  ;;  %v689_v11 = vadd.f32 1.0, %v1475_v9 }
 0xbbd   :  { %v690_v12 = vadd.f32 1.0, %v1477_v10 }
 0xbbe   :  { %1478 = vrcp.f32 %v689_v11 }
 0xbbf   :  { %1480 = vrcp.f32 %v690_v12 }
 0xbcb   :  { %v1479_v13 = vpop.eup %1478 }
 0xbcc   :  { %v1481_v17 = vpop.eup %1480  ;;  %v701_v23 = vmul.f32 %v1479_v13, %v697_v21 }
 0xbcd   :  { %v702_v24 = vmul.f32 %v1481_v17, %v698_v22 }
 0xc2a   :  { %v706_v15 = vpop.permute.xlu0 %705 }
 0xc2b   :  { %v708_v18 = vpop.permute.xlu1 %707  ;;  %v711_v19 = vmul.f32 %v1479_v13, %v706_v15 }
 0xc2c   :  { %v712_v20 = vmul.f32 %v1481_v17, %v708_v18 }
 0xc2d   :  { %715 = vrot.lane.b32.xlu0 %v711_v19, %s1538_s3 }
 0xc2e   :  { %717 = vrot.lane.b32.xlu1 %v712_v20, %s1538_s3 }
 0xc9f   :  { %v716_v25 = vpop.permute.xlu0 %715 }
 0xca0   :  { %v718_v26 = vpop.permute.xlu1 %717  ;;  %v721_v27 = vadd.f32 %v716_v25, %v701_v23 }
 0xca1   :  { %v722_v28 = vadd.f32 %v718_v26, %v702_v24 }
 0xca2   :  { %1482 = vtanh.f32 %v721_v27  ;;  %v835_v57 = vrot.slane %v721_v27, 7 }
 0xca3   :  { %1484 = vtanh.f32 %v722_v28  ;;  %v836_v58 = vrot.slane %v722_v28, 7 }
 0xcaf   :  { %v1483_v29 = vpop.eup %1482 }
 0xcb0   :  { %v1485_v30 = vpop.eup %1484  ;;  %727 = vrot.lane.b32.xlu0 %v1483_v29, %s1537_s1 }
 0xcb1   :  { %729 = vrot.lane.b32.xlu1 %v1485_v30, %s1537_s1 }
 0xd22   :  { %v728_v31 = vpop.permute.xlu0 %727 }
 0xd23   :  { %v730_v32 = vpop.permute.xlu1 %729  ;;  %v733_v33 = vmul.f32 %v1479_v13, %v728_v31 }
 0xd24   :  { %v734_v34 = vmul.f32 %v1481_v17, %v730_v32 }
 0xd25   :  { %v737_v35 = vrot.slane %v733_v33, 4 }
 0xd26   :  { %v738_v36 = vrot.slane %v734_v34, 3 }
 0xd28   :  { %v739_v37 = vsel %vm188_vm1, %v738_v36, %v737_v35 }
 0xd29   :  { %740 = vrot.lane.b32.xlu0 %v739_v37, %s1538_s3 }
 0xd9b   :  { %v741_v38 = vpop.permute.xlu0 %740 }
 0xd9c   :  { %1365 = vmatmul.mubr.msk.f32.vlgmr.msra.gmra.mxu1 %vm59_vm2, %v741_v38 }
 0xd9d   :  { %1379 = vmatpush3.msra.mxu1 %v1578_v1  ;;  %1386 = vmatprep.mubr.msk.f32.mxu1 %vm1535_vm0, %v1534_v0 }
 0xd9e   :  { %1380 = vmatprep.subr.mxu1 %v1534_v0 }
 0xd9f   :  { %1381 = vmatpush3.msra.mxu1 %v1583_v2 }
 0xda0   :  { %1382 = vmatprep.subr.mxu1 %v1534_v0 }
 0xda1   :  { %1383 = vmatpush3.msra.mxu1 %v1595_v5 }
 0xda2   :  { %1384 = vmatprep.subr.mxu1 %v1534_v0 }
 0xda3   :  { %1385 = vmatpush3.msra.mxu1 %v1606_v7 }
 0xe5c   :  { %v810_v39 = vpop.f32.mrf.mxu1 }
 0xe5d   :  { %v815_v40 = vrot.slane %v810_v39, 3  ;;  %v816_v41 = vrot.slane %v810_v39, 4 }
 0xe5e   :  { %v1366_v42 = vpop.f32.mrf.mxu1 }
 0xe5f   :  { %v819_v1 = vadd.f32 %v815_v40, %v1641_v16  ;;  %v820_v43 = vadd.f32 %v816_v41, %v1639_v14 }
 0xe61   :  { %1486 = vtanh.f32 %v819_v1  ;;  %v821_v5 = vsub.f32 0.0, %v819_v1  ;;  %v822_v45 = vsub.f32 0.0, %v820_v43 }
 0xe62   :  { %1488 = vtanh.f32 %v820_v43 }
 0xe63   :  { %v823_v46 = vmul.f32 1.442695, %v821_v5  ;;  %v825_v7 = vmul.f32 1.442695, %v822_v45 }
 0xe65   :  { %1490 = vpow2.f32 %v823_v46 }
 0xe66   :  { %1492 = vpow2.f32 %v825_v7 }
 0xe6e   :  { %v1487_v44 = vpop.eup %1486 }
 0xe6f   :  { %v1489_v2 = vpop.eup %1488  ;;  %843 = vrot.lane.b32.xlu1 %v1487_v44, %s1537_s1 }
 0xe70   :  { %845 = vrot.lane.b32.xlu0 %v1489_v2, %s1537_s1 }
 0xe72   :  { %v1491_v47 = vpop.eup %1490 }
 0xe73   :  { %v1493_v48 = vpop.eup %1492  ;;  %v827_v49 = vadd.f32 1.0, %v1491_v47 }
 0xe74   :  { %v828_v50 = vadd.f32 1.0, %v1493_v48 }
 0xe75   :  { %1494 = vrcp.f32 %v827_v49 }
 0xe76   :  { %1496 = vrcp.f32 %v828_v50 }
 0xe82   :  { %v1495_v51 = vpop.eup %1494 }
 0xe83   :  { %v1497_v53 = vpop.eup %1496  ;;  %v839_v59 = vmul.f32 %v1495_v51, %v835_v57 }
 0xe84   :  { %v840_v60 = vmul.f32 %v1497_v53, %v836_v58 }
 0xee1   :  { %v844_v52 = vpop.permute.xlu1 %843 }
 0xee2   :  { %v846_v54 = vpop.permute.xlu0 %845  ;;  %v849_v55 = vmul.f32 %v1495_v51, %v844_v52 }
 0xee3   :  { %v850_v56 = vmul.f32 %v1497_v53, %v846_v54 }
 0xee4   :  { %853 = vrot.lane.b32.xlu1 %v849_v55, %s1538_s3 }
 0xee5   :  { %855 = vrot.lane.b32.xlu0 %v850_v56, %s1538_s3 }
 0xf56   :  { %v854_v61 = vpop.permute.xlu1 %853 }
 0xf57   :  { %v856_v62 = vpop.permute.xlu0 %855  ;;  %v859_v63 = vadd.f32 %v854_v61, %v839_v59 }
 0xf58   :  { %v860_v3 = vadd.f32 %v856_v62, %v840_v60 }
 0xf59   :  { %1498 = vtanh.f32 %v859_v63  ;;  %v973_v40 = vrot.slane %v859_v63, 7 }
 0xf5a   :  { %1500 = vtanh.f32 %v860_v3  ;;  %v974_v41 = vrot.slane %v860_v3, 7 }
 0xf66   :  { %v1499_v4 = vpop.eup %1498 }
 0xf67   :  { %v1501_v6 = vpop.eup %1500  ;;  %865 = vrot.lane.b32.xlu1 %v1499_v4, %s1537_s1 }
 0xf68   :  { %867 = vrot.lane.b32.xlu0 %v1501_v6, %s1537_s1 }
 0xfd9   :  { %v866_v8 = vpop.permute.xlu1 %865 }
 0xfda   :  { %v868_v9 = vpop.permute.xlu0 %867  ;;  %v871_v10 = vmul.f32 %v1495_v51, %v866_v8 }
 0xfdb   :  { %v872_v11 = vmul.f32 %v1497_v53, %v868_v9 }
 0xfdc   :  { %v875_v12 = vrot.slane %v871_v10, 5 }
 0xfdd   :  { %v876_v13 = vrot.slane %v872_v11, 4 }
 0xfdf   :  { %v877_v15 = vsel %vm188_vm1, %v876_v13, %v875_v12 }
 0xfe0   :  { %878 = vrot.lane.b32.xlu1 %v877_v15, %s1538_s3 }
0x1052   :  { %v879_v17 = vpop.permute.xlu1 %878 }
0x1053   :  { %1376 = vmatmul.mubr.msk.f32.vlgmr.msra.gmra.mxu0 %vm59_vm2, %v879_v17 }
0x1054   :  { %1397 = vmatprep.mubr.msk.f32.mxu0 %vm1535_vm0, %v1534_v0 }
0x1113   :  { %v948_v18 = vpop.f32.mrf.mxu0 }
0x1114   :  { %v953_v19 = vrot.slane %v948_v18, 2  ;;  %v954_v20 = vrot.slane %v948_v18, 3 }
0x1115   :  { %v1377_v21 = vpop.f32.mrf.mxu0 }
0x1116   :  { %v957_v22 = vadd.f32 %v953_v19, %v1641_v16  ;;  %v958_v23 = vadd.f32 %v954_v20, %v1639_v14 }
0x1118   :  { %1502 = vtanh.f32 %v957_v22  ;;  %v959_v26 = vsub.f32 0.0, %v957_v22  ;;  %v960_v27 = vsub.f32 0.0, %v958_v23 }
0x1119   :  { %1504 = vtanh.f32 %v958_v23 }
0x111a   :  { %v961_v28 = vmul.f32 1.442695, %v959_v26  ;;  %v963_v29 = vmul.f32 1.442695, %v960_v27  ;;  %v1151_v26 = vld [vmem:[%s1819_s4 + $0x10] sm:$0xff]  ;;  %v1150_v27 = vld [vmem:[%s1819_s4 + $0x8] sm:$0xff] }
0x111c   :  { %1506 = vpow2.f32 %v961_v28  ;;  %v1149_v28 = vld [vmem:[%s1819_s4] sm:$0xff] }
0x111d   :  { %1508 = vpow2.f32 %v963_v29 }
0x1125   :  { %v1503_v24 = vpop.eup %1502 }
0x1126   :  { %v1505_v25 = vpop.eup %1504  ;;  %981 = vrot.lane.b32.xlu0 %v1503_v24, %s1537_s1 }
0x1127   :  { %983 = vrot.lane.b32.xlu1 %v1505_v25, %s1537_s1  ;;  %v1152_v25 = vld [vmem:[%s1819_s4 + $0x18] sm:$0xff] }
0x1128   :  { %1390 = vmatpush3.msra.mxu0 %v1152_v25 }
0x1129   :  { %v1507_v30 = vpop.eup %1506  ;;  %1391 = vmatprep.subr.mxu0 %v1534_v0 }
0x112a   :  { %v1509_v31 = vpop.eup %1508  ;;  %v965_v32 = vadd.f32 1.0, %v1507_v30  ;;  %1392 = vmatpush3.msra.mxu0 %v1151_v26 }
0x112b   :  { %v966_v33 = vadd.f32 1.0, %v1509_v31  ;;  %1393 = vmatprep.subr.mxu0 %v1534_v0  ;;  %v11_v31 = vstv %s1820_s5 }
0x112c   :  { %1510 = vrcp.f32 %v965_v32  ;;  %1394 = vmatpush3.msra.mxu0 %v1150_v27  ;;  %12 = vst [vmem:[#allocation2] sm:$0x1] %v11_v31 }
0x112d   :  { %1512 = vrcp.f32 %v966_v33  ;;  %1395 = vmatprep.subr.mxu0 %v1534_v0 }
0x112e   :  { %1396 = vmatpush3.msra.mxu0 %v1149_v28 }
0x1133   :  { %v1254_v0 = vld [vmem:[#allocation2] ss:$0 sm:$0xff] }
0x1139   :  { %v1511_v34 = vpop.eup %1510 }
0x113a   :  { %v1513_v36 = vpop.eup %1512  ;;  %v977_v42 = vmul.f32 %v1511_v34, %v973_v40 }
0x113b   :  { %v978_v1 = vmul.f32 %v1513_v36, %v974_v41 }
0x1198   :  { %v982_v35 = vpop.permute.xlu0 %981 }
0x1199   :  { %v984_v37 = vpop.permute.xlu1 %983  ;;  %v987_v38 = vmul.f32 %v1511_v34, %v982_v35 }
0x119a   :  { %v988_v39 = vmul.f32 %v1513_v36, %v984_v37 }
0x119b   :  { %991 = vrot.lane.b32.xlu0 %v987_v38, %s1538_s3 }
0x119c   :  { %993 = vrot.lane.b32.xlu1 %v988_v39, %s1538_s3 }
0x120d   :  { %v992_v43 = vpop.permute.xlu0 %991 }
0x120e   :  { %v994_v44 = vpop.permute.xlu1 %993  ;;  %v997_v2 = vadd.f32 %v992_v43, %v977_v42 }
0x120f   :  { %v998_v5 = vadd.f32 %v994_v44, %v978_v1 }
0x1210   :  { %1514 = vtanh.f32 %v997_v2  ;;  %v1111_v17 = vrot.slane %v997_v2, 7 }
0x1211   :  { %1516 = vtanh.f32 %v998_v5  ;;  %v1112_v18 = vrot.slane %v998_v5, 7 }
0x121d   :  { %v1515_v45 = vpop.eup %1514 }
0x121e   :  { %v1517_v46 = vpop.eup %1516  ;;  %1003 = vrot.lane.b32.xlu0 %v1515_v45, %s1537_s1 }
0x121f   :  { %1005 = vrot.lane.b32.xlu1 %v1517_v46, %s1537_s1 }
0x1290   :  { %v1004_v7 = vpop.permute.xlu0 %1003 }
0x1291   :  { %v1006_v47 = vpop.permute.xlu1 %1005  ;;  %v1009_v48 = vmul.f32 %v1511_v34, %v1004_v7 }
0x1292   :  { %v1010_v49 = vmul.f32 %v1513_v36, %v1006_v47 }
0x1293   :  { %v1013_v50 = vrot.slane %v1009_v48, 6 }
0x1294   :  { %v1014_v51 = vrot.slane %v1010_v49, 5 }
0x1296   :  { %v1015_v52 = vsel %vm188_vm1, %v1014_v51, %v1013_v50 }
0x1297   :  { %1016 = vrot.lane.b32.xlu0 %v1015_v52, %s1538_s3 }
0x1309   :  { %v1017_v53 = vpop.permute.xlu0 %1016 }
0x130a   :  { %1387 = vmatmul.mubr.msk.f32.vlgmr.msra.gmra.mxu1 %vm59_vm2, %v1017_v53 }
0x13ca   :  { %v1086_v54 = vpop.f32.mrf.mxu1 }
0x13cb   :  { %v1091_v55 = vrot.slane %v1086_v54, 1  ;;  %v1092_v56 = vrot.slane %v1086_v54, 2 }
0x13cc   :  { %v1388_v57 = vpop.f32.mrf.mxu1 }
0x13cd   :  { %v1095_v58 = vadd.f32 %v1091_v55, %v1641_v16  ;;  %v1096_v59 = vadd.f32 %v1092_v56, %v1639_v14 }
0x13cf   :  { %1518 = vtanh.f32 %v1095_v58  ;;  %v1097_v62 = vsub.f32 0.0, %v1095_v58  ;;  %v1098_v63 = vsub.f32 0.0, %v1096_v59 }
0x13d0   :  { %1520 = vtanh.f32 %v1096_v59 }
0x13d1   :  { %v1099_v3 = vmul.f32 1.442695, %v1097_v62  ;;  %v1101_v4 = vmul.f32 1.442695, %v1098_v63 }
0x13d3   :  { %1522 = vpow2.f32 %v1099_v3 }
0x13d4   :  { %1524 = vpow2.f32 %v1101_v4 }
0x13dc   :  { %v1519_v60 = vpop.eup %1518 }
0x13dd   :  { %v1521_v61 = vpop.eup %1520  ;;  %1119 = vrot.lane.b32.xlu1 %v1519_v60, %s1537_s1 }
0x13de   :  { %1121 = vrot.lane.b32.xlu0 %v1521_v61, %s1537_s1 }
0x13e0   :  { %v1523_v6 = vpop.eup %1522 }
0x13e1   :  { %v1525_v8 = vpop.eup %1524  ;;  %v1103_v9 = vadd.f32 1.0, %v1523_v6 }
0x13e2   :  { %v1104_v16 = vadd.f32 1.0, %v1525_v8 }
0x13e3   :  { %1526 = vrcp.f32 %v1103_v9 }
0x13e4   :  { %1528 = vrcp.f32 %v1104_v16 }
0x13f0   :  { %v1527_v14 = vpop.eup %1526 }
0x13f1   :  { %v1529_v11 = vpop.eup %1528  ;;  %v1115_v19 = vmul.f32 %v1527_v14, %v1111_v17 }
0x13f2   :  { %v1116_v20 = vmul.f32 %v1529_v11, %v1112_v18 }
0x144f   :  { %v1120_v10 = vpop.permute.xlu1 %1119 }
0x1450   :  { %v1122_v12 = vpop.permute.xlu0 %1121  ;;  %v1125_v13 = vmul.f32 %v1527_v14, %v1120_v10 }
0x1451   :  { %v1126_v15 = vmul.f32 %v1529_v11, %v1122_v12 }
0x1452   :  { %1129 = vrot.lane.b32.xlu1 %v1125_v13, %s1538_s3 }
0x1453   :  { %1131 = vrot.lane.b32.xlu0 %v1126_v15, %s1538_s3 }
0x14c4   :  { %v1130_v21 = vpop.permute.xlu1 %1129 }
0x14c5   :  { %v1132_v22 = vpop.permute.xlu0 %1131  ;;  %v1135_v23 = vadd.f32 %v1130_v21, %v1115_v19 }
0x14c6   :  { %v1136_v24 = vadd.f32 %v1132_v22, %v1116_v20 }
0x14c7   :  { %1530 = vtanh.f32 %v1135_v23 }
0x14c8   :  { %1532 = vtanh.f32 %v1136_v24 }
0x14d4   :  { %v1531_v29 = vpop.eup %1530 }
0x14d5   :  { %v1533_v30 = vpop.eup %1532  ;;  %1141 = vrot.lane.b32.xlu1 %v1531_v29, %s1537_s1 }
0x14d6   :  { %1143 = vrot.lane.b32.xlu0 %v1533_v30, %s1537_s1 }
0x1547   :  { %v1142_v32 = vpop.permute.xlu1 %1141 }
0x1548   :  { %v1144_v33 = vpop.permute.xlu0 %1143  ;;  %v1147_v34 = vmul.f32 %v1527_v14, %v1142_v32 }
0x1549   :  { %v1148_v35 = vmul.f32 %v1529_v11, %v1144_v33 }
0x154a   :  { %v1162_v36 = vrot.slane %v1147_v34, 7 }
0x154b   :  { %v1163_v37 = vrot.slane %v1148_v35, 6 }
0x154d   :  { %v1164_v38 = vsel %vm188_vm1, %v1163_v37, %v1162_v36 }
0x154e   :  { %1165 = vrot.lane.b32.xlu1 %v1164_v38, %s1538_s3 }
0x15c0   :  { %v1166_v39 = vpop.permute.xlu1 %1165 }
0x15c1   :  { %1398 = vmatmul.mubr.msk.f32.vlgmr.msra.gmra.mxu0 %vm59_vm2, %v1166_v39 }
0x1681   :  { %v1235_v40 = vpop.f32.mrf.mxu0 }
0x1682   :  { %v1236_v41 = vadd.f32 %v1254_v0, %v1235_v40 }
0x1683   :  { %v1399_v42 = vpop.f32.mrf.mxu0 }
0x1684   :  { %1240 = vst.msk [vmem:[%s1821_s6] sm:$0x3] %vm1239_vm3, %v1236_v41 }

</bundles_post_ra>
